<compile_context>
chip_gen: v6e
topology: v6e:2x2x1
jax: 0.10.0
libtpu: 0.0.40
codegen_flags: <defaults>
</compile_context>

<pallas_src>
import functools
import math

import jax
import jax.numpy as jnp
from jax import lax
from jax.experimental import pallas as pl
from jax.experimental.pallas import tpu as pltpu

NEG_SLOPE = 0.33            # nn.LeakyReLU(negative_slope=0.33)
BN_EPS = 1e-5               # nn.BatchNorm1d default eps
VMEM_LIMIT = 32 * 1024 * 1024


def _leaky_relu(h):
    # slope < 1  =>  LeakyReLU(h) == max(h, slope*h): one VPU max, no cmp+select.
    return jnp.maximum(h, NEG_SLOPE * h)


def _evidence_epilogue_t(z, *, eps, logspace):
    # z: [num_output, tile_n], rows already permuted (host side) to
    # [gamma, nu, alpha, beta] logits -> whole epilogue is sublane-wise selects
    # on lane-dense vregs (VPU/EUP only, no lane slices / concat).
    row = lax.broadcasted_iota(jnp.int32, z.shape, 0)
    sp = jnp.logaddexp(z, 0.0) + eps                 # softplus(z) + eps
    if logspace:
        g = 2.0 * z                                  # nn.Identity()
    else:
        g = 2.0 * jax.nn.sigmoid(z)                  # nn.Sigmoid()
    out = jnp.where(row == 0, g, sp)                 # gamma | nu | . | beta
    out = jnp.where(row == 2, jnp.maximum(sp + 1.0, 1.0), out)   # alpha
    if not logspace:
        out = jnp.maximum(out, eps)                  # torch.clamp(out, min=eps)
    return out


# ----------------------------------------------------------------------------
# Stats pass (only when the batch spans multiple tiles): per-tile partial
# (sum, M2) of leaky_relu(linear1(x)) for BatchNorm statistics.  Each tile
# writes its own output block ("parallel" grid); the wrapper combines partials
# with the parallel-variance formula (numerically stable).
# ----------------------------------------------------------------------------
def _stats_kernel(x_ref, w1_ref, b1_ref, sum_ref, m2_ref, *, n_valid, tile_n):
    i = pl.program_id(0)
    h = jnp.dot(x_ref[...].astype(jnp.bfloat16), w1_ref[...],
                preferred_element_type=jnp.float32)
    h = _leaky_relu(h + b1_ref[...])

    if n_valid % tile_n != 0:   # ragged last tile: mask padding rows out
        row = i * tile_n + lax.broadcasted_iota(jnp.int32, (tile_n, 1), 0)
        valid = row < n_valid
        cnt = jnp.minimum(tile_n, n_valid - i * tile_n).astype(jnp.float32)
        hm = jnp.where(valid, h, 0.0)
        s = jnp.sum(hm, axis=0, keepdims=True)
        mean_t = s / cnt
        d = jnp.where(valid, h - mean_t, 0.0)
    else:
        s = jnp.sum(h, axis=0, keepdims=True)
        mean_t = s / float(tile_n)
        d = h - mean_t
    m2 = jnp.sum(d * d, axis=0, keepdims=True)

    sum_ref[...] = s.reshape(sum_ref.shape)
    m2_ref[...] = m2.reshape(m2_ref.shape)


# ----------------------------------------------------------------------------
# Main pass: linear1 -> LeakyReLU -> BatchNorm -> linear2 -> LeakyReLU ->
# linear3 (transposed, lane-dense) -> evidential epilogue; one batch tile per
# grid step.
# ----------------------------------------------------------------------------
def _forward_kernel(x_ref, w1_ref, b1_ref, mean_ref, rstd_ref, bnw_ref, bnb_ref,
                    w2_ref, b2_ref, w3t_ref, b3t_ref, out_ref,
                    *, eps, logspace, bn_mode, n_valid):
    # self.norm1(x): the reference DISCARDS the result (running-stat update
    # only), so it contributes nothing to the forward value -> no-op here.
    h = jnp.dot(x_ref[...].astype(jnp.bfloat16), w1_ref[...],
                preferred_element_type=jnp.float32)
    h = _leaky_relu(h + b1_ref[...])

    if bn_mode == "global":
        # Batch statistics precomputed by the stats pass (full-batch, biased).
        h = (h - mean_ref[...]) * rstd_ref[...] * bnw_ref[...] + bnb_ref[...]
    elif bn_mode == "local":
        # Single tile covers the whole batch: compute stats in-kernel.
        cnt = float(n_valid)
        if n_valid != h.shape[0]:
            row = lax.broadcasted_iota(jnp.int32, (h.shape[0], 1), 0)
            valid = row < n_valid
        else:
            valid = None
        hm = h if valid is None else jnp.where(valid, h, 0.0)
        mean = jnp.sum(hm, axis=0, keepdims=True) / cnt
        d = h - mean
        dm = d if valid is None else jnp.where(valid, d, 0.0)
        var = jnp.sum(dm * dm, axis=0, keepdims=True) / cnt   # biased (training)
        rstd = lax.rsqrt(var + BN_EPS)
        h = d * rstd * bnw_ref[...] + bnb_ref[...]
    # bn_mode == "none": batch == 1, reference skips norm2 entirely.

    h = jnp.dot(h.astype(jnp.bfloat16), w2_ref[...],
                preferred_element_type=jnp.float32)
    h = _leaky_relu(h + b2_ref[...])

    # linear3 computed transposed: z = w3^T . h^T -> [num_output, tile_n].
    # Lane-dense output tile: unmasked vst, tiny out buffer, epilogue EUP /32.
    z = lax.dot_general(w3t_ref[...], h.astype(jnp.bfloat16),
                        dimension_numbers=(((1,), (1,)), ((), ())),
                        preferred_element_type=jnp.float32)
    z = z + b3t_ref[...]
    out_ref[...] = _evidence_epilogue_t(z, eps=eps, logspace=logspace)


# ----------------------------------------------------------------------------
# Wrapper
# ----------------------------------------------------------------------------
def _round_up(a, b):
    return -(-a // b) * b


def evidential_momentum_net(x, params, *, eps=0.0, logspace=False, tile_n=4096):
    """Forward pass. x: [N, num_input] float32; params store W as [in, out].

    Precision contract: matmul operands are cast to bf16 (f32 accumulation);
    outputs match an f32 reference to ~1e-2 relative error.
    """
    n, num_input = x.shape
    num_hidden = params["w1"].shape[1]
    num_output = params["w3"].shape[1]

    # Batch tile: multiple of 128 so the transposed output block
    # (num_output, tile) is lane-aligned.  No host-side pad / cast of x.
    tn = _round_up(min(int(tile_n), _round_up(max(n, 1), 128)), 128)
    num_tiles = -(-n // tn)

    # ---- host-side layout plumbing (weights only; all tiny, one-time) -------
    w1 = params["w1"].astype(jnp.bfloat16)
    w2 = params["w2"].astype(jnp.bfloat16)
    perm = (3, 0, 1, 2)                    # -> rows [gamma, nu, alpha, beta]
    w3t = params["w3"][:, perm].T.astype(jnp.bfloat16)     # [num_output, hidden]
    b3t = params["b3"][:, perm].T                           # [num_output, 1]
    b1, b2 = params["b1"], params["b2"]
    bn_w, bn_b = params["bn_w"], params["bn_b"]

    x_spec = pl.BlockSpec((tn, num_input), lambda i: (i, 0))
    res = lambda r, c: pl.BlockSpec((r, c), lambda i: (0, 0))   # grid-resident

    # ---- BatchNorm statistics ------------------------------------------------
    if n <= 1:
        bn_mode = "none"            # matches the `if x.shape[0] > 1` gate
    elif num_tiles == 1:
        bn_mode = "local"           # fuse stats into the main kernel
    else:
        bn_mode = "global"          # parallel per-tile partial stats pass

    mean = jnp.zeros((1, num_hidden), jnp.float32)
    rstd = jnp.ones((1, num_hidden), jnp.float32)
    if bn_mode == "global":
        part_spec = pl.BlockSpec((1, 1, num_hidden), lambda i: (i, 0, 0))
        sums, m2s = pl.pallas_call(
            functools.partial(_stats_kernel, n_valid=n, tile_n=tn),
            out_shape=(
                jax.ShapeDtypeStruct((num_tiles, 1, num_hidden), jnp.float32),
                jax.ShapeDtypeStruct((num_tiles, 1, num_hidden), jnp.float32)),
            grid=(num_tiles,),
            in_specs=[x_spec, res(num_input, num_hidden), res(1, num_hidden)],
            out_specs=(part_spec, part_spec),
            compiler_params=pltpu.CompilerParams(
                dimension_semantics=("parallel",),   # both TCs on v7x
                vmem_limit_bytes=VMEM_LIMIT),
        )(x, w1, b1)
        sums = sums.reshape(num_tiles, num_hidden)
        m2s = m2s.reshape(num_tiles, num_hidden)
        counts = jnp.clip(n - jnp.arange(num_tiles) * tn, 0, tn
                          ).astype(jnp.float32)[:, None]
        mean = jnp.sum(sums, axis=0, keepdims=True) / n
        tile_means = sums / counts
        m2 = jnp.sum(m2s, axis=0, keepdims=True) + jnp.sum(
            counts * (tile_means - mean) ** 2, axis=0, keepdims=True)
        var = m2 / n                               # biased (training) variance
        rstd = lax.rsqrt(var + BN_EPS)

    # ---- main forward pass (batch-parallel, double-buffered x / out) --------
    out_t = pl.pallas_call(
        functools.partial(_forward_kernel, eps=eps, logspace=logspace,
                          bn_mode=bn_mode, n_valid=n),
        out_shape=jax.ShapeDtypeStruct((num_output, n), jnp.float32),
        grid=(num_tiles,),
        in_specs=[x_spec,
                  res(num_input, num_hidden), res(1, num_hidden),    # w1, b1
                  res(1, num_hidden), res(1, num_hidden),            # mean, rstd
                  res(1, num_hidden), res(1, num_hidden),            # bn_w, bn_b
                  res(num_hidden, num_hidden), res(1, num_hidden),   # w2, b2
                  res(num_output, num_hidden), res(num_output, 1)],  # w3t, b3t
        out_specs=pl.BlockSpec((num_output, tn), lambda i: (0, i)),
        compiler_params=pltpu.CompilerParams(
            dimension_semantics=("parallel",),   # megacore shard on v7x
            vmem_limit_bytes=VMEM_LIMIT),
    )(x, w1, b1, mean, rstd, bn_w, bn_b, w2, b2, w3t, b3t)

    return out_t.T                               # [n, num_output] host-side


# ----------------------------------------------------------------------------
# Pure-JAX f32 reference (mirrors the PyTorch forward) and PyTorch-style init.
# ----------------------------------------------------------------------------
def reference_forward(x, params, *, eps=0.0, logspace=False):
    h = x @ params["w1"] + params["b1"]
    h = jnp.where(h >= 0, h, NEG_SLOPE * h)
    if x.shape[0] > 1:
        mean = jnp.mean(h, axis=0, keepdims=True)
        var = jnp.mean((h - mean) ** 2, axis=0, keepdims=True)
        h = (h - mean) * lax.rsqrt(var + BN_EPS) * params["bn_w"] + params["bn_b"]
    h = h @ params["w2"] + params["b2"]
    h = jnp.where(h >= 0, h, NEG_SLOPE * h)
    z = h @ params["w3"] + params["b3"]
    sp = jnp.logaddexp(z[:, :3], 0.0) + eps
    v, alpha, beta = sp[:, 0:1], jnp.maximum(sp[:, 1:2] + 1.0, 1.0), sp[:, 2:3]
    g = 2.0 * (z[:, 3:4] if logspace else jax.nn.sigmoid(z[:, 3:4]))
    out = jnp.concatenate([g, v, alpha, beta], axis=1)
    return out if logspace else jnp.maximum(out, eps)


def init_params(key, num_input, num_hidden=128, num_output=4):
    """Deterministic PyTorch-style init (U(-1/sqrt(fan_in), 1/sqrt(fan_in)))."""
    ks = jax.random.split(key, 6)

    def linear(kw, kb, fan_in, fan_out):
        bound = 1.0 / math.sqrt(fan_in)
        w = jax.random.uniform(kw, (fan_in, fan_out), jnp.float32, -bound, bound)
        b = jax.random.uniform(kb, (1, fan_out), jnp.float32, -bound, bound)
        return w, b

    w1, b1 = linear(ks[0], ks[1], num_input, num_hidden)
    w2, b2 = linear(ks[2], ks[3], num_hidden, num_hidden)
    w3, b3 = linear(ks[4], ks[5], num_hidden, num_output)
    return {
        "w1": w1, "b1": b1, "w2": w2, "b2": b2, "w3": w3, "b3": b3,
        "bn_w": jnp.ones((1, num_hidden), jnp.float32),   # BatchNorm1d weight
        "bn_b": jnp.zeros((1, num_hidden), jnp.float32),  # BatchNorm1d bias
    }


if __name__ == "__main__":
    key = jax.random.PRNGKey(0)
    k_x, k_p = jax.random.split(key)

    num_input = 16
    num_hidden = 128      # module default
    num_output = 4
    batch = 200           # not a multiple of 128 -> exercises boundary masking

    params = init_params(k_p, num_input, num_hidden, num_output)
    x = jax.random.normal(k_x, (batch, num_input), dtype=jnp.float32)
    ref = reference_forward(x, params, eps=0.0, logspace=False)

    # Multi-tile path: 2 batch tiles -> parallel partial-stats pass + forward.
    ev_tiled = evidential_momentum_net(x, params, eps=0.0, logspace=False,
                                       tile_n=128)
    # Single-tile path: default tile covers the batch -> fused in-kernel BN.
    ev_fused = evidential_momentum_net(x, params, eps=0.0, logspace=False)
    # batch == 1 path: reference skips norm2 entirely.
    x1 = x[:1]
    ref1 = reference_forward(x1, params, eps=0.0, logspace=False)
    ev_one = evidential_momentum_net(x1, params, eps=0.0, logspace=False)

    ev_tiled, ev_fused, ev_one = jax.block_until_ready(
        (ev_tiled, ev_fused, ev_one))

    for ev, expect in ((ev_tiled, ref), (ev_fused, ref), (ev_one, ref1)):
        assert ev.shape == expect.shape
        assert bool(jnp.all(jnp.isfinite(ev)))
        # columns: [gamma in (0,2), nu >= 0, alpha >= 1, beta >= 0]
        assert bool(jnp.all(ev >= 0.0))
        assert bool(jnp.all(ev[:, 0] <= 2.0))
        assert bool(jnp.all(ev[:, 2] >= 1.0))
        err = float(jnp.max(jnp.abs(ev - expect)))
        assert err < 0.1, f"mismatch vs f32 reference: {err}"

    print("KERNEL_OK")
</pallas_src>

<mosaic_0001>
module attributes {stable_mosaic.version = 11 : i64} {
  func.func @_stats_kernel(%arg0: i32, %arg1: memref<128x16xf32, #tpu.memory_space<vmem>>, %arg2: memref<16x128xbf16, #tpu.memory_space<vmem>>, %arg3: memref<1x128xf32, #tpu.memory_space<vmem>>, %arg4: memref<1x1x128xf32, #tpu.memory_space<vmem>>, %arg5: memref<1x1x128xf32, #tpu.memory_space<vmem>>) attributes {dimension_semantics = [#tpu.dimension_semantics<parallel>], iteration_bounds = array<i64: 2>, scalar_prefetch = 0 : i64, scratch_operands = 0 : i64, tpu.core_type = #tpu.core_type<tc>, window_params = [{transform_indices = @transform_0, window_bounds = array<i64: 128, 16>}, {pipeline_mode = #tpu.pipeline_mode<synchronous>, transform_indices = @transform_1, window_bounds = array<i64: 16, 128>}, {pipeline_mode = #tpu.pipeline_mode<synchronous>, transform_indices = @transform_2, window_bounds = array<i64: 1, 128>}, {transform_indices = @transform_3, window_bounds = array<i64: 1, 1, 128>}, {transform_indices = @transform_4, window_bounds = array<i64: 1, 1, 128>}]} {
    %c0 = arith.constant 0 : index
    %c0_0 = arith.constant 0 : index
    %0 = vector.load %arg1[%c0, %c0_0] : memref<128x16xf32, #tpu.memory_space<vmem>>, vector<128x16xf32>
    %1 = arith.truncf %0 : vector<128x16xf32> to vector<128x16xbf16>
    %c0_1 = arith.constant 0 : index
    %c0_2 = arith.constant 0 : index
    %2 = vector.load %arg2[%c0_1, %c0_2] : memref<16x128xbf16, #tpu.memory_space<vmem>>, vector<16x128xbf16>
    %cst = arith.constant dense<0.000000e+00> : vector<128x128xf32>
    %3 = tpu.matmul %1, %2, %cst {dimension_numbers = #tpu.dot_dimension_numbers<[1], [0], [0], [1], [0, 0, 1, 1], [], []>} : vector<128x16xbf16>, vector<16x128xbf16>, vector<128x128xf32> -> vector<128x128xf32>
    %c0_3 = arith.constant 0 : index
    %c0_4 = arith.constant 0 : index
    %4 = vector.load %arg3[%c0_3, %c0_4] : memref<1x128xf32, #tpu.memory_space<vmem>>, vector<1x128xf32>
    %5 = vector.broadcast %4 : vector<1x128xf32> to vector<128x128xf32>
    %6 = arith.addf %3, %5 : vector<128x128xf32>
    %cst_5 = arith.constant 3.300000e-01 : f32
    %7 = vector.broadcast %cst_5 : f32 to vector<128x128xf32>
    %8 = arith.mulf %7, %6 : vector<128x128xf32>
    %9 = arith.maximumf %6, %8 : vector<128x128xf32>
    %c128_i32 = arith.constant 128 : i32
    %10 = arith.muli %arg0, %c128_i32 : i32
    %11 = tpu.iota {dimensions = array<i32: 0>} : vector<128x1xi32>
    %12 = vector.broadcast %10 : i32 to vector<128x1xi32>
    %13 = arith.addi %12, %11 : vector<128x1xi32>
    %c200_i32 = arith.constant 200 : i32
    %14 = vector.broadcast %c200_i32 : i32 to vector<128x1xi32>
    %15 = arith.cmpi slt, %13, %14 : vector<128x1xi32>
    %c128_i32_6 = arith.constant 128 : i32
    %16 = arith.muli %arg0, %c128_i32_6 : i32
    %c200_i32_7 = arith.constant 200 : i32
    %17 = arith.subi %c200_i32_7, %16 : i32
    %c128_i32_8 = arith.constant 128 : i32
    %18 = arith.minsi %c128_i32_8, %17 : i32
    %19 = arith.sitofp %18 : i32 to f32
    %cst_9 = arith.constant 0.000000e+00 : f32
    %20 = vector.shape_cast %15 : vector<128x1xi1> to vector<128x1xi1>
    %21 = vector.broadcast %20 : vector<128x1xi1> to vector<128x128xi1>
    %22 = vector.broadcast %cst_9 : f32 to vector<128x128xf32>
    %23 = arith.select %21, %9, %22 : vector<128x128xi1>, vector<128x128xf32>
    %cst_10 = arith.constant dense<0.000000e+00> : vector<128xf32>
    %24 = vector.multi_reduction <add>, %23, %cst_10 [0] : vector<128x128xf32> to vector<128xf32>
    %25 = vector.shape_cast %24 : vector<128xf32> to vector<1x128xf32>
    %26 = vector.broadcast %19 : f32 to vector<1x128xf32>
    %27 = arith.divf %25, %26 : vector<1x128xf32>
    %28 = vector.broadcast %27 : vector<1x128xf32> to vector<128x128xf32>
    %29 = arith.subf %9, %28 : vector<128x128xf32>
    %cst_11 = arith.constant 0.000000e+00 : f32
    %30 = vector.shape_cast %15 : vector<128x1xi1> to vector<128x1xi1>
    %31 = vector.broadcast %30 : vector<128x1xi1> to vector<128x128xi1>
    %32 = vector.broadcast %cst_11 : f32 to vector<128x128xf32>
    %33 = arith.select %31, %29, %32 : vector<128x128xi1>, vector<128x128xf32>
    %34 = arith.mulf %33, %33 : vector<128x128xf32>
    %cst_12 = arith.constant dense<0.000000e+00> : vector<128xf32>
    %35 = vector.multi_reduction <add>, %34, %cst_12 [0] : vector<128x128xf32> to vector<128xf32>
    %36 = vector.shape_cast %35 : vector<128xf32> to vector<1x128xf32>
    %37 = vector.shape_cast %25 : vector<1x128xf32> to vector<1x1x128xf32>
    %c0_13 = arith.constant 0 : index
    %c0_14 = arith.constant 0 : index
    %c0_15 = arith.constant 0 : index
    %38 = vector.load %arg4[%c0_13, %c0_14, %c0_15] : memref<1x1x128xf32, #tpu.memory_space<vmem>>, vector<1x1x128xf32>
    tpu.vector_store %arg4[%c0_13, %c0_14, %c0_15], %37 {strides = array<i32>} : memref<1x1x128xf32, #tpu.memory_space<vmem>>, vector<1x1x128xf32>,
    %39 = vector.shape_cast %36 : vector<1x128xf32> to vector<1x1x128xf32>
    %c0_16 = arith.constant 0 : index
    %c0_17 = arith.constant 0 : index
    %c0_18 = arith.constant 0 : index
    %40 = vector.load %arg5[%c0_16, %c0_17, %c0_18] : memref<1x1x128xf32, #tpu.memory_space<vmem>>, vector<1x1x128xf32>
    tpu.vector_store %arg5[%c0_16, %c0_17, %c0_18], %39 {strides = array<i32>} : memref<1x1x128xf32, #tpu.memory_space<vmem>>, vector<1x1x128xf32>,
    return
  }
  func.func @transform_0(%arg0: i32) -> (i32, i32) {
    %c0_i32 = arith.constant 0 : i32
    %c0_i32_0 = arith.constant 0 : i32
    return %arg0, %c0_i32 : i32, i32
  }
  func.func @transform_1(%arg0: i32) -> (i32, i32) {
    %c0_i32 = arith.constant 0 : i32
    %c0_i32_0 = arith.constant 0 : i32
    %c0_i32_1 = arith.constant 0 : i32
    return %c0_i32, %c0_i32_0 : i32, i32
  }
  func.func @transform_2(%arg0: i32) -> (i32, i32) {
    %c0_i32 = arith.constant 0 : i32
    %c0_i32_0 = arith.constant 0 : i32
    %c0_i32_1 = arith.constant 0 : i32
    return %c0_i32, %c0_i32_0 : i32, i32
  }
  func.func @transform_3(%arg0: i32) -> (i32, i32, i32) {
    %c0_i32 = arith.constant 0 : i32
    %c0_i32_0 = arith.constant 0 : i32
    %c0_i32_1 = arith.constant 0 : i32
    return %arg0, %c0_i32, %c0_i32_0 : i32, i32, i32
  }
  func.func @transform_4(%arg0: i32) -> (i32, i32, i32) {
    %c0_i32 = arith.constant 0 : i32
    %c0_i32_0 = arith.constant 0 : i32
    %c0_i32_1 = arith.constant 0 : i32
    return %arg0, %c0_i32, %c0_i32_0 : i32, i32, i32
  }
}

</mosaic_0001>

<bundles_post_ra>
// kernel: tpu_custom_call.1
= control target key start
LH: loop header
LB: loop body
LE: loop exit
PB: predicated region body
PF: predicated region fallthrough
CT: control target
= control target key end

     0   :  { %10 = vsyncpa [#allocation3], 0  ;;  %s1342_s0 = inlined_call_operand.vmem [shape: f32[200,16], index: 0, kind: input, shape index: {}]   ;;  %s1343_s1 = inlined_call_operand.vmem [shape: bf16[16,128], index: 1, kind: input, shape index: {}]   ;;  %s1344_s2 = inlined_call_operand.vmem [shape: f32[1,128], index: 2, kind: input, shape index: {}]   ;;  %s1345_s3 = inlined_call_operand.hbm [shape: f32[2,1,128], index: 3, kind: output, shape index: {0}]   ;;  %s1346_s4 = inlined_call_operand.hbm [shape: f32[2,1,128], index: 4, kind: output, shape index: {1}]  }
   0x1   :  { %12 = vsyncpa [#allocation3 + $0x1], 0 }
   0x2   :  { %13 = vsyncpa [#allocation5], 0 }
   0x3   :  { %15 = vsyncpa [#allocation5 + $0x1], 0  ;;  %s948_s15 = smov 0   ;;  %s950_s16 = smov 0  }
   0x4   :  { %s952_s17 = smov 0   ;;  %s954_s18 = smov 0  }
   0x5 LB: > { %s969_s19 = sadd.s32 4294967295, %s919_s18   ;;  %s732_s20 = sadd.s32 4294967294, %s919_s18   ;;  %s919_s18 = sphi %s954_s18, %s1352_s18   ;;  %s915_s17 = sphi %s952_s17, %s1351_s17   ;;  %s911_s16 = sphi %s950_s16, %s1350_s16   ;;  %s907_s15 = sphi %s948_s15, %s1349_s15  }
   0x6   : > { %s973_s21 = sadd.s32 1, %s919_s18   ;;  %s96_s22 = sadd.s32 1, %s915_s17 }
   0x7   : > { %s93_s23 = ssub.s32 %s919_s18, %s973_s21  ;;  %p106_p0 = scmp.ne.s32.totalorder %s915_s17, %s911_s16 }
   0x8   : > { %p94_p1 = scmp.eq.s32.totalorder %s93_s23, 0  ;;  %p107_p2 = scmp.eq.s32.totalorder %s969_s19, 1 }
   0x9   : > { %p112_p3 = scmp.ne.s32.totalorder %s911_s16, %s907_s15  ;;  %p113_p4 = scmp.eq.s32.totalorder %s732_s20, 1 }
   0xa   : > { %s984_s24 = scalar_select %p94_p1, %s915_s17, %s96_s22  }
   0xb   : > { %p986_p5 = por %p107_p2, %p106_p0  ;;  %p990_p6 = por %p113_p4, %p112_p3 }
   0xc   : > { %p735_p7 = scmp.ge.s32.totalorder %s919_s18, 1  ;;  %p180_p8 = scmp.lt.s32.totalorder %s919_s18, 3 }
   0xe   : > { %p181_p9 = pnand %p735_p7, %p180_p8 }
   0xf   : > { %s1000_s29 = sshll.u32 (!%p181_p9), %s969_s19, 4  ;;  %s748_s11 = sshll.u32 (!%p181_p9), %s969_s19, 7 }
  0x10   : > { %184 = sbr.rel (%p181_p9) target bundleno = 349 (0x15d), region = 32  ;;  %p218_p10 = scmp.lt.s32.totalorder (!%p181_p9), %s1000_s29, 24 }
  0x11   : > { %s1127_s12 = ssub.s32 (!%p181_p9), 200, %s748_s11  ;;  %s1215_s14 = sand.u32 (!%p181_p9), 1, %s911_s16  }
  0x12   : > { %p473_p11 = scmp.lt.s32.totalorder (!%p181_p9), %s1127_s12, 128  ;;  %s206_s19 = scalar_lea.vmem (!%p181_p9), [#allocation2], %s1215_s14 }
  0x13   : > { %s636_s20 = sshll.u32 (!%p181_p9), %s206_s19, 4  ;;  %s1222_s27 = scalar_lea.hbm (!%p181_p9), %s1345_s3, %s1000_s29  ;;  %s637_s20 = int_to_ptr.vmem [resolvable:$true] %s636_s20 }
  0x14   : > { %s620_s28 = scalar_lea.sflag (!%p181_p9), [#allocation3], %s1215_s14 }
  0x15   : > { %v826_v0 = vld [vmem:[%s1343_s1] sm:$0xff]   ;;  %s219_s30 = scalar_select %p218_p10, %s1000_s29, 24  ;;  %vm267_vm0 = vcmask 130048   ;;  %v422_v25 = vlaneseq  ;;  %v1028_v34 = vstv %s748_s11 }
  0x16   : > { %762 = vmatprep.subr.bf16.mxu0 %v826_v0  ;;  %780 = vmatprep.subr.bf16.mxu1 %v826_v0  ;;  %v1020_v28 = vld [vmem:[%s1344_s2] ss:$0 sm:$0xff]  ;;  %s1354_s12 = smov (!%p473_p11, %s1127_s12), 128 }
  0x17   : > { %763 = vmatpush3.bf16.msra.mxu0 %v826_v0  ;;  %781 = vmatpush3.bf16.msra.mxu1 %v826_v0  ;;  %s737_s5 = sshll.u32 %s219_s30, 3  ;;  %v1015_v26 = vshrl.u32 %v422_v25, 7  ;;  %s475_s13 = scvt.s32.f32 %s1354_s12 }
  0x18   : > { %s221_s8 = scalar_lea.vmem %s1342_s0, %s737_s5  ;;  %s829_s30 = scalar_lea.vmem %s637_s20, 16 }
  0x19   : > { %v228_v1 = vld [vmem:[%s221_s8] sm:$0xff]  ;;  %v229_v2 = vld [vmem:[%s221_s8 + $0x8] sm:$0xff]  ;;  %v230_v3 = vld [vmem:[%s221_s8 + $0x10] sm:$0xff]  ;;  %v425_v29 = vadd.s32 16, %v1015_v26  ;;  %v424_v31 = vadd.s32 8, %v1015_v26  ;;  %v426_v37 = vadd.s32 24, %v1015_v26  ;;  %v1034_v40 = vadd.s32 %v1028_v34, %v1015_v26  ;;  %p830_p12 = scmp.ne.s32.totalorder %s637_s20, %s829_s30 }
  0x1a   : > { %v244_v4 = vpack.c.bf16 %v229_v2, %v228_v1  ;;  %v231_v5 = vld [vmem:[%s221_s8 + $0x18] sm:$0xff]  ;;  %v232_v6 = vld [vmem:[%s221_s8 + $0x20] sm:$0xff]  ;;  %v233_v7 = vld [vmem:[%s221_s8 + $0x28] sm:$0xff]  ;;  %v427_v51 = vadd.s32 32, %v1015_v26  ;;  %v429_v55 = vadd.s32 48, %v1015_v26  ;;  %v428_v57 = vadd.s32 40, %v1015_v26 }
  0x1b   : > { %v245_v8 = vpack.c.bf16 %v231_v5, %v230_v3  ;;  %v246_v9 = vpack.c.bf16 %v233_v7, %v232_v6  ;;  %v236_v10 = vld [vmem:[%s221_s8 + $0x40] sm:$0xff]  ;;  %v237_v11 = vld [vmem:[%s221_s8 + $0x48] sm:$0xff]  ;;  %v238_v13 = vld [vmem:[%s221_s8 + $0x50] sm:$0xff]  ;;  %v1038_v42 = vadd.s32 %v1028_v34, %v425_v29  ;;  %v1041_v44 = vadd.s32 %v1028_v34, %v424_v31  ;;  %p831_p13 = pnand %p830_p12, %p986_p5  ;;  %s921_s5 = smov [#allocation2]  }
  0x1c   : > { %764 = vmatprep.mubr.msk.bf16.mxu0 %vm267_vm0, %v244_v4  ;;  %v248_v12 = vpack.c.bf16 %v237_v11, %v236_v10  ;;  %v239_v14 = vld [vmem:[%s221_s8 + $0x58] sm:$0xff]  ;;  %v240_v16 = vld [vmem:[%s221_s8 + $0x60] sm:$0xff]  ;;  %v241_v17 = vld [vmem:[%s221_s8 + $0x68] sm:$0xff]  ;;  %v1047_v49 = vadd.s32 %v1028_v34, %v426_v37  ;;  %vm456_vm1 = vcmp.lt.s32.totalorder %v1034_v40, 200  ;;  %v1068_v0 = vadd.s32 %v1028_v34, %v427_v51  ;;  %s833_s6 = sshll.u32 %s921_s5, 4  ;;  %s834_s6 = int_to_ptr.vmem [resolvable:$false] %s833_s6 }
  0x1d   : > { %765 = vmatmul.mubr.msk.bf16.vlgmr.msra.gmra.mxu0 %vm267_vm0, %v245_v8  ;;  %v249_v15 = vpack.c.bf16 %v239_v14, %v238_v13  ;;  %v234_v18 = vld [vmem:[%s221_s8 + $0x30] sm:$0xff]  ;;  %v235_v19 = vld [vmem:[%s221_s8 + $0x38] sm:$0xff]  ;;  %v250_v20 = vpack.c.bf16 %v241_v17, %v240_v16  ;;  %vm458_vm2 = vcmp.lt.s32.totalorder %v1038_v42, 200  ;;  %vm457_vm3 = vcmp.lt.s32.totalorder %v1041_v44, 200  ;;  %p832_p0 = pneg %p831_p13  ;;  %s835_s7 = scalar_lea.vmem %s834_s6, 32 }
  0x1e   : > { %768 = vmatprep.mubr.msk.bf16.mxu0 %vm267_vm0, %v246_v9  ;;  %772 = vmatprep.mubr.msk.bf16.mxu1 %vm267_vm0, %v248_v12  ;;  %v242_v21 = vld [vmem:[%s221_s8 + $0x70] sm:$0xff]  ;;  %v243_v22 = vld [vmem:[%s221_s8 + $0x78] sm:$0xff]  ;;  %v247_v23 = vpack.c.bf16 %v235_v19, %v234_v18  ;;  %vm459_vm4 = vcmp.lt.s32.totalorder %v1047_v49, 200  ;;  %v430_v2 = vadd.s32 56, %v1015_v26  ;;  %v1078_v8 = vadd.s32 %v1028_v34, %v429_v55  ;;  %p836_p1 = scmp.lt.s32.totalorder %s637_s20, %s834_s6  ;;  %p837_p2 = scmp.lt.s32.totalorder %s835_s7, %s829_s30 }
  0x1f   : > { %773 = vmatmul.mubr.msk.bf16.vlgmr.msra.gmra.mxu1 %vm267_vm0, %v249_v15  ;;  %v251_v24 = vpack.c.bf16 %v243_v22, %v242_v21  ;;  %v1082_v11 = vadd.s32 %v1028_v34, %v428_v57  ;;  %vm460_vm5 = vcmp.lt.s32.totalorder %v1068_v0, 200  ;;  %v431_v18 = vadd.s32 64, %v1015_v26 }
  0x20   : > { %776 = vmatprep.mubr.msk.bf16.mxu1 %vm267_vm0, %v250_v20  ;;  %v1093_v19 = vadd.s32 %v1028_v34, %v430_v2  ;;  %vm462_vm7 = vcmp.lt.s32.totalorder %v1078_v8, 200  ;;  %v435_v57 = vadd.s32 96, %v1015_v26  ;;  %p838_p3 = por %p837_p2, %p836_p1 }
  0x21   : > { %vm461_vm6 = vcmp.lt.s32.totalorder %v1082_v11, 200  ;;  %v1112_v37 = vadd.s32 %v1028_v34, %v431_v18 }
  0x22   : > { %vm463_vm8 = vcmp.lt.s32.totalorder %v1093_v19, 200  ;;  %p839_p4 = pnand %p838_p3, %p832_p0 }
  0x23   : > { %vm464_vm9 = vcmp.lt.s32.totalorder %v1112_v37, 200 }
  0x25   : > { %769 = vmatmul.mubr.msk.bf16.gmra.mxu0 %vm267_vm0, %v247_v23 }
  0x27   : > { %777 = vmatmul.mubr.msk.bf16.gmra.mxu1 %vm267_vm0, %v251_v24 }
  0xdd   : > { %v766_v27 = vpop.f32.mrf.mxu0 }
  0xde   : > { %v335_v33 = vadd.f32 %v766_v27, %v1020_v28  ;;  %v432_v27 = vadd.s32 72, %v1015_v26 }
  0xdf   : > { %v326_v30 = vpop.f32.mrf.mxu0  ;;  %v774_v32 = vpop.f32.mrf.mxu1 }
  0xe0   : > { %v327_v35 = vadd.f32 %v1020_v28, %v326_v30  ;;  %v391_v46 = vmul.f32 0.33, %v335_v33  ;;  %v367_v24 = vadd.f32 %v774_v32, %v1020_v28  ;;  %v433_v32 = vadd.s32 80, %v1015_v26 }
  0xe1   : > { %v767_v36 = vpop.f32.mrf.mxu0  ;;  %v358_v38 = vpop.f32.mrf.mxu1 }
  0xe2   : > { %v389_v39 = vmul.f32 0.33, %v327_v35  ;;  %v338_v41 = vadd.f32 %v767_v36, %v1020_v28  ;;  %v1057_v59 = vmax.f32 %v335_v33, %v391_v46  ;;  %v359_v9 = vadd.f32 %v1020_v28, %v358_v38 }
  0xe3   : > { %v329_v43 = vpop.f32.mrf.mxu0  ;;  %v775_v45 = vpop.f32.mrf.mxu1  ;;  %v434_v46 = vadd.s32 88, %v1015_v26  ;;  %v1136_v55 = vadd.s32 %v1028_v34, %v433_v32 }
  0xe4   : > { %v330_v47 = vadd.f32 %v1020_v28, %v329_v43  ;;  %v1044_v48 = vmax.f32 %v327_v35, %v389_v39  ;;  %v392_v53 = vmul.f32 0.33, %v338_v41  ;;  %v510_v13 = vsel %vm458_vm2, %v1057_v59, 0.0 }
  0xe5   : > { %v770_v50 = vpop.f32.mrf.mxu0  ;;  %v361_v52 = vpop.f32.mrf.mxu1  ;;  %v397_v33 = vmul.f32 0.33, %v359_v9  ;;  %v370_v39 = vadd.f32 %v775_v45, %v1020_v28  ;;  %v1148_v2 = vadd.s32 %v1028_v34, %v434_v46  ;;  %vm466_vm11 = vcmp.lt.s32.totalorder %v1136_v55, 200 }
  0xe6   : > { %v390_v54 = vmul.f32 0.33, %v330_v47  ;;  %v351_v61 = vadd.f32 %v770_v50, %v1020_v28  ;;  %v508_v63 = vsel %vm456_vm1, %v1044_v48, 0.0  ;;  %v1071_v3 = vmax.f32 %v338_v41, %v392_v53 }
  0xe7   : > { %v342_v56 = vpop.f32.mrf.mxu0  ;;  %v1055_v58 = vpop.f32.mrf.mxu1  ;;  %v362_v23 = vadd.f32 %v1020_v28, %v361_v52  ;;  %v1123_v50 = vadd.s32 %v1028_v34, %v432_v27  ;;  %v399_v52 = vmul.f32 0.33, %v367_v24  ;;  %v1132_v53 = vmax.f32 %v359_v9, %v397_v33 }
  0xe8   : > { %v1059_v60 = vmax.f32 %v330_v47, %v390_v54  ;;  %v343_v62 = vadd.f32 %v1020_v28, %v342_v56  ;;  %v395_v14 = vmul.f32 0.33, %v351_v61  ;;  %v511_v20 = vsel %vm459_vm4, %v1071_v3, 0.0 }
  0xe9   : > { %v771_v1 = vpop.f32.mrf.mxu0  ;;  %v374_v12 = vpop.f32.mrf.mxu1  ;;  %v398_v43 = vmul.f32 0.33, %v362_v23  ;;  %vm465_vm10 = vcmp.lt.s32.totalorder %v1123_v50, 200  ;;  %v383_v9 = vadd.f32 %v1055_v58, %v1020_v28  ;;  %vm467_vm12 = vcmp.lt.s32.totalorder %v1148_v2, 200 }
  0xea   : > { %v509_v4 = vsel %vm457_vm3, %v1059_v60, 0.0  ;;  %v393_v5 = vmul.f32 0.33, %v343_v62  ;;  %v354_v6 = vadd.f32 %v771_v1, %v1020_v28  ;;  %v1102_v30 = vmax.f32 %v351_v61, %v395_v14 }
  0xeb   : > { %v524_v7 = vadd.f32 %v509_v4, %v508_v63  ;;  %v345_v10 = vpop.f32.mrf.mxu0  ;;  %v779_v29 = vpop.f32.mrf.mxu1  ;;  %v375_v54 = vadd.f32 %v1020_v28, %v374_v12  ;;  %v1143_v63 = vmax.f32 %v362_v23, %v398_v43  ;;  %v1162_v14 = vadd.s32 %v1028_v34, %v435_v57 }
  0xec   : > { %v1087_v15 = vmax.f32 %v343_v62, %v393_v5  ;;  %v346_v16 = vadd.f32 %v1020_v28, %v345_v10  ;;  %v396_v21 = vmul.f32 0.33, %v354_v6  ;;  %v514_v45 = vsel %vm462_vm7, %v1102_v30, 0.0 }
  0xed   : > { %v525_v17 = vadd.f32 %v524_v7, %v510_v13  ;;  %v377_v51 = vpop.f32.mrf.mxu1  ;;  %v400_v62 = vmul.f32 0.33, %v370_v39  ;;  %v436_v5 = vadd.s32 104, %v1015_v26  ;;  %v516_v7 = vsel %vm464_vm9, %v1132_v53, 0.0 }
  0xee   : > { %v394_v22 = vmul.f32 0.33, %v346_v16  ;;  %v512_v31 = vsel %vm460_vm5, %v1087_v15, 0.0  ;;  %v1114_v38 = vmax.f32 %v354_v6, %v396_v21  ;;  %v378_v1 = vadd.f32 %v1020_v28, %v377_v51 }
  0xef   : > { %v526_v25 = vadd.f32 %v525_v17, %v511_v20  ;;  %v1152_v6 = vmax.f32 %v367_v24, %v399_v52  ;;  %v401_v10 = vmul.f32 0.33, %v375_v54  ;;  %v437_v13 = vadd.s32 112, %v1015_v26 }
  0xf0   : > { %v1107_v35 = vmax.f32 %v346_v16, %v394_v22  ;;  %v515_v61 = vsel %vm463_vm8, %v1114_v38, 0.0  ;;  %v1164_v16 = vmax.f32 %v370_v39, %v400_v62  ;;  %v517_v17 = vsel %vm465_vm10, %v1143_v63, 0.0 }
  0xf1   : > { %v527_v36 = vadd.f32 %v526_v25, %v512_v31  ;;  %v386_v18 = vadd.f32 %v779_v29, %v1020_v28  ;;  %v402_v20 = vmul.f32 0.33, %v378_v1  ;;  %v438_v21 = vadd.s32 120, %v1015_v26 }
  0xf2   : > { %v513_v41 = vsel %vm461_vm6, %v1107_v35, 0.0  ;;  %v1176_v22 = vadd.s32 %v1028_v34, %v436_v5  ;;  %v518_v23 = vsel %vm466_vm11, %v1152_v6, 0.0  ;;  %v403_v24 = vmul.f32 0.33, %v383_v9 }
  0xf3   : > { %v528_v47 = vadd.f32 %v527_v36, %v513_v41  ;;  %v1181_v25 = vmax.f32 %v375_v54, %v401_v10  ;;  %v1184_v28 = vadd.s32 %v1028_v34, %v437_v13  ;;  %vm468_vm13 = vcmp.lt.s32.totalorder %v1162_v14, 200 }
  0xf4   : > { %v519_v26 = vsel %vm467_vm12, %v1164_v16, 0.0  ;;  %v404_v29 = vmul.f32 0.33, %v386_v18  ;;  %v1190_v31 = vmax.f32 %v378_v1, %v402_v20  ;;  %v1193_v32 = vadd.s32 %v1028_v34, %v438_v21 }
  0xf5   : > { %v529_v56 = vadd.f32 %v528_v47, %v514_v45  ;;  %vm469_vm14 = vcmp.lt.s32.totalorder %v1176_v22, 200  ;;  %v1196_v36 = vmax.f32 %v383_v9, %v403_v24  ;;  %v520_v39 = vsel %vm468_vm13, %v1181_v25, 0.0 }
  0xf6   : > { %vm470_vm15 = vcmp.lt.s32.totalorder %v1184_v28, 200  ;;  %v1202_v43 = vmax.f32 %v386_v18, %v404_v29  ;;  %v521_v46 = vsel %vm469_vm14, %v1190_v31, 0.0  ;;  %v545_v34 = vstv %s475_s13 }
  0xf7   : > { %v530_v4 = vadd.f32 %v529_v56, %v515_v61  ;;  %vm471_vm0 = vcmp.lt.s32.totalorder %v1193_v32, 200  ;;  %v522_v51 = vsel %vm470_vm15, %v1196_v36, 0.0  ;;  %827 = vrcp.f32 %v545_v34 }
  0xf8   : > { %v523_v52 = vsel %vm471_vm0, %v1202_v43, 0.0 }
  0xf9   : > { %v531_v12 = vadd.f32 %v530_v4, %v516_v7 }
  0xfb   : > { %v532_v58 = vadd.f32 %v531_v12, %v517_v17 }
  0xfd   : > { %v533_v27 = vadd.f32 %v532_v58, %v518_v23 }
  0xff   : > { %v534_v33 = vadd.f32 %v533_v27, %v519_v26 }
 0x101   : > { %v535_v41 = vadd.f32 %v534_v33, %v520_v39 }
 0x103   : > { %v536_v47 = vadd.f32 %v535_v41, %v521_v46 }
 0x104   : > { %v828_v4 = vpop.eup %827 }
 0x105   : > { %v537_v45 = vadd.f32 %v536_v47, %v522_v51 }
 0x107   : > { %v538_v54 = vadd.f32 %v537_v45, %v523_v52 }
 0x109   : > { %v539_v56 = vrot.slane %v538_v54, 4 }
 0x10b   : > { %v540_v57 = vadd.f32 %v539_v56, %v538_v54 }
 0x10d   : > { %v541_v61 = vrot.slane %v540_v57, 2 }
 0x10f   : > { %v542_v62 = vadd.f32 %v541_v61, %v540_v57 }
 0x111   : > { %v543_v1 = vrot.slane %v542_v62, 1 }
 0x113   : > { %v544_v5 = vadd.f32 %v543_v1, %v542_v62 }
 0x115   : > { %v1224_v7 = vmul.f32 %v828_v4, %v544_v5  ;;  %617 = vst [vmem:[%s206_s19] sm:$0x1] %v544_v5 }
 0x116   : > { %842 = shalt.err (!%p839_p4)
}
 0x117   : > { %s843_s8 = scalar_lea.hbm %s1222_s27, 16  ;;  %s847_s11 = scalar_lea.hbm %s1345_s3, 32 }
 0x118   : > { %p844_p7 = scmp.ne.s32.totalorder %s1222_s27, %s843_s8  ;;  %p848_p10 = scmp.lt.s32.totalorder %s1222_s27, %s1345_s3 }
 0x119   : > { %p849_p11 = scmp.lt.s32.totalorder %s847_s11, %s843_s8 }
 0x11a   : > { %p845_p8 = pnand %p844_p7, %p986_p5 }
 0x11b   : > { %p850_p12 = por %p849_p11, %p848_p10 }
 0x11c   : > { %p846_p9 = pneg %p845_p8 }
 0x11e   : > { %p851_p13 = pnand %p850_p12, %p846_p9 }
 0x120   : > { %854 = shalt.err (!%p851_p13)
}
 0x121   : > { %782 = dma.vmem_to_hbm [thread:$0]  (%p986_p5), %s637_s20, 16, %s1222_s27, %s620_s28   ;;  %v548_v9 = vsub.f32 %v1044_v48, %v1224_v7  ;;  %v549_v10 = vsub.f32 %v1059_v60, %v1224_v7  ;;  %v550_v12 = vsub.f32 %v1057_v59, %v1224_v7  ;;  %v551_v18 = vsub.f32 %v1071_v3, %v1224_v7 }
 0x122   : > { %v552_v48 = vsub.f32 %v1087_v15, %v1224_v7  ;;  %v553_v59 = vsub.f32 %v1107_v35, %v1224_v7  ;;  %v554_v23 = vsub.f32 %v1102_v30, %v1224_v7  ;;  %v555_v42 = vsub.f32 %v1114_v38, %v1224_v7  ;;  %s212_s19 = scalar_lea.vmem [#allocation4], %s1215_s14  ;;  %s647_s27 = scalar_lea.hbm %s1346_s4, %s1000_s29 }
 0x123   : > { %v564_v13 = vsel %vm456_vm1, %v548_v9, 0.0  ;;  %v565_v17 = vsel %vm457_vm3, %v549_v10, 0.0  ;;  %v566_v60 = vsel %vm458_vm2, %v550_v12, 0.0  ;;  %v567_v40 = vsel %vm459_vm4, %v551_v18, 0.0  ;;  %s649_s20 = sshll.u32 %s212_s19, 4  ;;  %s624_s28 = scalar_lea.sflag [#allocation5], %s1215_s14  ;;  %s650_s20 = int_to_ptr.vmem [resolvable:$true] %s649_s20 }
 0x124   : > { %v580_v20 = vmul.f32 %v564_v13, %v564_v13  ;;  %v581_v58 = vmul.f32 %v565_v17, %v565_v17  ;;  %v582_v21 = vmul.f32 %v566_v60, %v566_v60  ;;  %v568_v3 = vsel %vm460_vm5, %v552_v48, 0.0  ;;  %s855_s30 = scalar_lea.vmem %s650_s20, 16  ;;  %s922_s5 = smov [#allocation4]  }
 0x125   : > { %v583_v24 = vmul.f32 %v567_v40, %v567_v40  ;;  %v569_v15 = vsel %vm461_vm6, %v553_v59, 0.0  ;;  %v584_v35 = vmul.f32 %v568_v3, %v568_v3  ;;  %v556_v49 = vsub.f32 %v1132_v53, %v1224_v7  ;;  %p856_p0 = scmp.ne.s32.totalorder %s650_s20, %s855_s30  ;;  %s859_s6 = sshll.u32 %s922_s5, 4  ;;  %s860_s6 = int_to_ptr.vmem [resolvable:$false] %s859_s6 }
 0x126   : > { %v596_v44 = vadd.f32 %v581_v58, %v580_v20  ;;  %v570_v29 = vsel %vm462_vm7, %v554_v23, 0.0  ;;  %v585_v30 = vmul.f32 %v569_v15, %v569_v15  ;;  %v557_v0 = vsub.f32 %v1143_v63, %v1224_v7  ;;  %s861_s7 = scalar_lea.vmem %s860_s6, 32  ;;  %p862_p3 = scmp.lt.s32.totalorder %s650_s20, %s860_s6 }
 0x127   : > { %v571_v39 = vsel %vm463_vm8, %v555_v42, 0.0  ;;  %v586_v38 = vmul.f32 %v570_v29, %v570_v29  ;;  %v558_v11 = vsub.f32 %v1152_v6, %v1224_v7  ;;  %v572_v46 = vsel %vm464_vm9, %v556_v49, 0.0  ;;  %p857_p1 = pnand %p856_p0, %p986_p5  ;;  %p863_p4 = scmp.lt.s32.totalorder %s861_s7, %s855_s30 }
 0x128   : > { %v597_v27 = vadd.f32 %v596_v44, %v582_v21  ;;  %v587_v53 = vmul.f32 %v571_v39, %v571_v39  ;;  %v559_v8 = vsub.f32 %v1164_v16, %v1224_v7  ;;  %v573_v47 = vsel %vm465_vm10, %v557_v0, 0.0 }
 0x129   : > { %v588_v63 = vmul.f32 %v572_v46, %v572_v46  ;;  %v560_v19 = vsub.f32 %v1181_v25, %v1224_v7  ;;  %v574_v45 = vsel %vm466_vm11, %v558_v11, 0.0  ;;  %v589_v6 = vmul.f32 %v573_v47, %v573_v47  ;;  %p858_p2 = pneg %p857_p1  ;;  %p864_p7 = por %p863_p4, %p862_p3 }
 0x12a   : > { %v598_v26 = vadd.f32 %v597_v27, %v583_v24  ;;  %v561_v37 = vsub.f32 %v1190_v31, %v1224_v7  ;;  %v575_v54 = vsel %vm467_vm12, %v559_v8, 0.0  ;;  %v590_v16 = vmul.f32 %v574_v45, %v574_v45 }
 0x12b   : > { %v562_v50 = vsub.f32 %v1196_v36, %v1224_v7  ;;  %v576_v57 = vsel %vm468_vm13, %v560_v19, 0.0  ;;  %v591_v25 = vmul.f32 %v575_v54, %v575_v54  ;;  %v563_v62 = vsub.f32 %v1202_v43, %v1224_v7  ;;  %p865_p8 = pnand %p864_p7, %p858_p2 }
 0x12c   : > { %v599_v33 = vadd.f32 %v598_v26, %v584_v35  ;;  %v577_v55 = vsel %vm469_vm14, %v561_v37, 0.0  ;;  %v592_v31 = vmul.f32 %v576_v57, %v576_v57 }
 0x12d   : > { %v578_v1 = vsel %vm470_vm15, %v562_v50, 0.0  ;;  %v593_v4 = vmul.f32 %v577_v55, %v577_v55  ;;  %v579_v14 = vsel %vm471_vm0, %v563_v62, 0.0 }
 0x12e   : > { %v600_v41 = vadd.f32 %v599_v33, %v585_v30  ;;  %v594_v5 = vmul.f32 %v578_v1, %v578_v1  ;;  %v595_v10 = vmul.f32 %v579_v14, %v579_v14 }
 0x130   : > { %v601_v34 = vadd.f32 %v600_v41, %v586_v38 }
 0x132   : > { %v602_v51 = vadd.f32 %v601_v34, %v587_v53 }
 0x134   : > { %v603_v52 = vadd.f32 %v602_v51, %v588_v63 }
 0x136   : > { %v604_v56 = vadd.f32 %v603_v52, %v589_v6 }
 0x138   : > { %v605_v61 = vadd.f32 %v604_v56, %v590_v16 }
 0x13a   : > { %v606_v2 = vadd.f32 %v605_v61, %v591_v25 }
 0x13c   : > { %v607_v36 = vadd.f32 %v606_v2, %v592_v31 }
 0x13e   : > { %v608_v9 = vadd.f32 %v607_v36, %v593_v4 }
 0x140   : > { %v609_v22 = vadd.f32 %v608_v9, %v594_v5 }
 0x142   : > { %v610_v12 = vadd.f32 %v609_v22, %v595_v10 }
 0x144   : > { %v611_v43 = vrot.slane %v610_v12, 4 }
 0x146   : > { %v612_v7 = vadd.f32 %v611_v43, %v610_v12 }
 0x148   : > { %v613_v13 = vrot.slane %v612_v7, 2 }
 0x14a   : > { %v614_v17 = vadd.f32 %v613_v13, %v612_v7 }
 0x14c   : > { %v615_v28 = vrot.slane %v614_v17, 1 }
 0x14e   : > { %v616_v18 = vadd.f32 %v615_v28, %v614_v17 }
 0x150   : > { %618 = vst [vmem:[%s212_s19] sm:$0x1] %v616_v18 }
 0x151   : > { %868 = shalt.err (!%p865_p8)
}
 0x152   : > { %s869_s8 = scalar_lea.hbm %s647_s27, 16  ;;  %s873_s9 = scalar_lea.hbm %s1346_s4, 32 }
 0x153   : > { %p870_p9 = scmp.ne.s32.totalorder %s647_s27, %s869_s8  ;;  %p874_p12 = scmp.lt.s32.totalorder %s647_s27, %s1346_s4 }
 0x154   : > { %p875_p13 = scmp.lt.s32.totalorder %s873_s9, %s869_s8 }
 0x155   : > { %p871_p10 = pnand %p870_p9, %p986_p5 }
 0x156   : > { %p876_p0 = por %p875_p13, %p874_p12 }
 0x157   : > { %p872_p11 = pneg %p871_p10 }
 0x159   : > { %p877_p1 = pnand %p876_p0, %p872_p11 }
 0x15b   : > { %880 = shalt.err (!%p877_p1)
}
 0x15c   : > { %783 = dma.vmem_to_hbm [thread:$0]  (%p986_p5), %s650_s20, 16, %s647_s27, %s624_s28  }
 0x15d PF: > { %p793_p2 = scmp.ge.s32.totalorder %s919_s18, 2  ;;  %s661_s12 = sand.u32 1, %s907_s15  }
 0x15e   : > { %s662_s13 = scalar_lea.sflag [#allocation3], %s661_s12 }
 0x15f   : > { %p787_p3 = pnand %p793_p2, %p990_p6 }
 0x161   : > { %p788_p4 = pneg %p787_p3 }
 0x163   : > { %898 = dma.done.wait (%p788_p4), %s662_s13, 16  }
 0x164   : > { %900 = vsyncadd (%p788_p4), %s662_s13, 4294967280  ;;  %s670_s19 = scalar_lea.sflag [#allocation5], %s661_s12 }
 0x165   : > { %902 = dma.done.wait (%p788_p4), %s670_s19, 16  }
 0x166   : > { %904 = vsyncadd (%p788_p4), %s670_s19, 4294967280  ;;  %p18_p5 = scmp.ge.s32.totalorder %s973_s21, 4   ;;  %s1349_s15 = smov %s911_s16 }
 0x167   : > { %s1350_s16 = smov %s915_s17  ;;  %s1351_s17 = smov %s984_s24 }
 0x168   : > { %s1352_s18 = smov %s973_s21  ;;  %20 = sbr.rel (!%p18_p5) target bundleno = 5 (0x5), region = 84 }
 0x16d   :  { %674 = vsyncpa [#allocation3], 1 }
 0x16e   :  { %676 = vsyncpa [#allocation3 + $0x1], 1 }
 0x16f   :  { %677 = vsyncpa [#allocation5], 1 }
 0x170   :  { %679 = vsyncpa [#allocation5 + $0x1], 1 }

</bundles_post_ra>
